<compile_context>
chip_gen: v5e
topology: v5e:2x2
jax: 0.10.0
libtpu: 0.0.40
codegen_flags: <defaults>
</compile_context>

<pallas_src>
import functools
import math

import jax
import jax.numpy as jnp
from jax.experimental import pallas as pl
from jax.experimental.pallas import tpu as pltpu

D_MODEL = 32                 # input_dim == d_model == node_length
SEQ     = 8                  # sequence length implied by x.view(B, -1, D)
FLAT    = SEQ * D_MODEL      # 256 = 2 x 128 lanes (lane-dense input block)
HIDDEN  = 64                 # dim_feedforward
MLP1    = 128                # mlp_hidden_dims[0]
MLP2    = 64                 # mlp_hidden_dims[1] (forward output; mlp_hidden_dims[2]=1 unused)
OUT_PAD = 128                # lane-dense padded head output
EPS     = 1e-5
VEC_ROWS = 16                # packed vector slab rows (10 used, padded to 16)

# rows of the packed (16, 256) f32 vector slab
_BQK, _BVO, _G1, _BE1, _B1, _B2, _G2, _BE2, _BM1, _BM2 = range(10)

WEIGHT_ORDER = ("wqk", "fold8", "expand8", "wvo", "w1", "w2", "wm1", "wm2")


def _layernorm(h, gamma, beta):
    mu = jnp.mean(h, axis=-1, keepdims=True)
    var = jnp.mean(jnp.square(h - mu), axis=-1, keepdims=True)
    return (h - mu) * jax.lax.rsqrt(var + EPS) * gamma + beta


def encoder_former_kernel(x_ref, wqk_ref, fold_ref, expand_ref, wvo_ref,
                          w1_ref, w2_ref, wm1_ref, wm2_ref, vec_ref, o_ref):
    x = x_ref[...]                                   # (bt, 256) bf16; token s at lanes [32s:32s+32]
    vec = vec_ref[...]                               # (16, 256) f32 packed vectors

    b_qkt = vec[_BQK:_BQK + 1, :]                    # (1, 256)  (bq Wk / sqrt(D), tiled x8)
    b_vo  = vec[_BVO:_BVO + 1, :D_MODEL]             # (1, 32)   (bv Wo^T + bo)
    g1    = vec[_G1:_G1 + 1,   :D_MODEL]
    be1   = vec[_BE1:_BE1 + 1, :D_MODEL]
    b1    = vec[_B1:_B1 + 1,   :HIDDEN]
    b2    = vec[_B2:_B2 + 1,   :D_MODEL]
    g2    = vec[_G2:_G2 + 1,   :D_MODEL]
    be2   = vec[_BE2:_BE2 + 1, :D_MODEL]
    bm1   = vec[_BM1:_BM1 + 1, :MLP1]
    bm2   = vec[_BM2:_BM2 + 1, :OUT_PAD]             # lanes 64.. are zero

    x0 = x[:, :D_MODEL]                              # (bt, 32) bf16, token 0
    x0f = x0.astype(jnp.float32)                     # residual / LayerNorm base

    # ---- self-attention for token 0; K and V are never materialized ----
    # TODO(synk): attn_mask=None only (the module's default); masked attention not wired up.
    # qk = x0 @ (Wq^T Wk / sqrt(D)) + bq Wk / sqrt(D), replicated once per token (256 lanes).
    qk_t = jnp.dot(x0, wqk_ref[...], preferred_element_type=jnp.float32) + b_qkt   # (bt, 256) f32
    # scores_s = sum_d qk[b, d] * x[b, 32 s + d]  (query-side bias term cancels in softmax)
    prod = qk_t.astype(jnp.bfloat16) * x                                            # (bt, 256) bf16
    s8 = jnp.dot(prod, fold_ref[...], preferred_element_type=jnp.float32)           # (bt, 8) f32
    s8 = s8 - jnp.max(s8, axis=-1, keepdims=True)
    p8 = jnp.exp(s8)
    p8 = p8 / jnp.sum(p8, axis=-1, keepdims=True)    # exact divide keeps sum_s p_s == 1
    # broadcast p_s over its 32 lanes, weight the raw tokens, contract with Wv^T Wo^T.
    p_t = jnp.dot(p8.astype(jnp.bfloat16), expand_ref[...],
                  preferred_element_type=jnp.float32)                               # (bt, 256) f32
    pv = p_t.astype(jnp.bfloat16) * x                                               # (bt, 256) bf16
    sa0 = jnp.dot(pv, wvo_ref[...], preferred_element_type=jnp.float32) + b_vo      # (bt, 32) f32

    # residual + layernorm1 (post-norm; dropout1 = identity at eval)
    h0 = _layernorm(x0f + sa0, g1, be1)

    # ---- feed-forward on token 0 only ----
    f = jnp.dot(h0.astype(jnp.bfloat16), w1_ref[...],
                preferred_element_type=jnp.float32) + b1                            # (bt, 64)
    # TODO(synk): PyTorch 'gelu' default is the erf-exact variant; tanh approximation used here.
    f = jax.nn.gelu(f, approximate=True)
    f = jnp.dot(f.astype(jnp.bfloat16), w2_ref[...],
                preferred_element_type=jnp.float32) + b2                            # (bt, 32)
    h2 = _layernorm(h0 + f, g2, be2)                 # dropout2 = identity

    # ---- LoRA-merged MLP head (dropouts identity; ReLU after both linears) ----
    m = jnp.dot(h2.astype(jnp.bfloat16), wm1_ref[...],
                preferred_element_type=jnp.float32) + bm1                           # (bt, 128)
    m = jnp.maximum(m, 0.0)
    m = jnp.dot(m.astype(jnp.bfloat16), wm2_ref[...],
                preferred_element_type=jnp.float32) + bm2                           # (bt, 128)
    m = jnp.maximum(m, 0.0)                          # lanes 64.. stay zero (padded wm2/bm2)
    o_ref[...] = m.astype(o_ref.dtype)               # bf16, lane-dense store


def _cdiv(a, b):
    return -(-a // b)


def _round_up(a, b):
    return (a + b - 1) // b * b


@functools.partial(jax.jit, static_argnames=("b_tile",))
def encoder_former_forward(x_flat, params, b_tile=4096):
    """x_flat: (B, S*D) -> (B, 64) float32."""
    B = x_flat.shape[0]
    x = x_flat.reshape(B, FLAT).astype(jnp.bfloat16)     # bf16 DMA: halves input HBM traffic

    # Balanced batch tiling; >= 2 grid steps so "parallel" can feed both v7x TensorCores.
    n_tiles = max(2, _cdiv(B, b_tile))
    bt = _round_up(_cdiv(B, n_tiles), 8)                 # multiple of 8 sublanes, <= ~b_tile
    Bp = n_tiles * bt
    if Bp != B:
        x = jnp.pad(x, ((0, Bp - B), (0, 0)))

    weights = [params[k] for k in WEIGHT_ORDER]
    vec = params["vec"]

    def const_spec(shape):                               # VMEM-resident across grid steps
        return pl.BlockSpec(shape, lambda i: (0,) * len(shape))

    out = pl.pallas_call(
        encoder_former_kernel,
        out_shape=jax.ShapeDtypeStruct((Bp, OUT_PAD), jnp.bfloat16),
        grid=(n_tiles,),
        in_specs=[pl.BlockSpec((bt, FLAT), lambda i: (i, 0))]
                 + [const_spec(w.shape) for w in weights]
                 + [const_spec(vec.shape)],
        out_specs=pl.BlockSpec((bt, OUT_PAD), lambda i: (i, 0)),
        compiler_params=pltpu.CompilerParams(
            dimension_semantics=("parallel",),
            vmem_limit_bytes=48 * 1024 * 1024),
    )(x, *weights, vec)
    return out[:B, :MLP2].astype(jnp.float32)


def init_params(key):
    """Random PyTorch-layout parameters, pre-folded into the kernel layout."""
    D, H, S = D_MODEL, HIDDEN, SEQ
    ks = jax.random.split(key, 20)
    nrm = lambda k, shape, s=0.05: jax.random.normal(k, shape, dtype=jnp.float32) * s

    # self-attention in_proj (PyTorch (3D, D) split into q/k/v, (out, in)) + out_proj
    wq, wk, wv = nrm(ks[0], (D, D)), nrm(ks[1], (D, D)), nrm(ks[2], (D, D))
    bq, bk, bv = nrm(ks[3], (1, D)), nrm(ks[4], (1, D)), nrm(ks[5], (1, D))
    wo, bo = nrm(ks[6], (D, D)), nrm(ks[7], (1, D))
    g1, be1 = jnp.ones((1, D), jnp.float32), jnp.zeros((1, D), jnp.float32)
    w1, b1 = nrm(ks[8], (H, D)), nrm(ks[9], (1, H))
    w2, b2 = nrm(ks[10], (D, H)), nrm(ks[11], (1, D))
    g2, be2 = jnp.ones((1, D), jnp.float32), jnp.zeros((1, D), jnp.float32)

    # MLP head: lora.Linear(D, 128, r=32) -> W_eff = W + (B @ A) * (alpha/r), alpha=1
    wm1 = nrm(ks[12], (MLP1, D))
    a1, bl1 = nrm(ks[13], (32, D)), nrm(ks[14], (MLP1, 32))
    wm1_eff = wm1 + (bl1 @ a1) * (1.0 / 32.0)
    bm1 = nrm(ks[15], (1, MLP1))
    # lora.Linear(128, 64, r=16)
    wm2 = nrm(ks[16], (MLP2, MLP1))
    a2, bl2 = nrm(ks[17], (16, MLP1)), nrm(ks[18], (MLP2, 16))
    wm2_eff = wm2 + (bl2 @ a2) * (1.0 / 16.0)
    bm2 = nrm(ks[19], (1, MLP2))

    scale = 1.0 / math.sqrt(D)

    # ---- algebraic folds (see kernel header) ----
    # scores_s = x0 @ (Wq^T Wk * scale) . x_s   (query-side bias term cancels in softmax)
    w_qk = (wq.T @ wk) * scale                       # (32, 32)
    b_qk = (bq @ wk) * scale                         # (1, 32)
    # attn @ Wo^T + bo = (sum_s p_s x_s) @ (Wv^T Wo^T) + (bv Wo^T + bo)
    w_vo = wv.T @ wo.T                               # (32, 32)
    b_vo = bv @ wo.T + bo                            # (1, 32)

    p = {}
    p["wqk"]     = jnp.tile(w_qk, (1, S)).astype(jnp.bfloat16)        # (32, 256)
    p["wvo"]     = jnp.tile(w_vo, (S, 1)).astype(jnp.bfloat16)        # (256, 32)
    eye = jnp.eye(S, dtype=jnp.float32)
    p["fold8"]   = jnp.repeat(eye, D, axis=0).astype(jnp.bfloat16)    # (256, 8): sum 32-lane groups
    p["expand8"] = jnp.repeat(eye, D, axis=1).astype(jnp.bfloat16)    # (8, 256): broadcast p_s over 32 lanes
    p["w1"]  = w1.T.astype(jnp.bfloat16)                              # (32, 64)
    p["w2"]  = w2.T.astype(jnp.bfloat16)                              # (64, 32)
    p["wm1"] = wm1_eff.T.astype(jnp.bfloat16)                         # (32, 128)
    p["wm2"] = jnp.pad(wm2_eff.T, ((0, 0), (0, OUT_PAD - MLP2))
                       ).astype(jnp.bfloat16)                         # (128, 128)

    # pack all small bias / layernorm vectors into one (16, 256) f32 slab
    def row(v):
        v = jnp.asarray(v, jnp.float32).reshape(-1)
        return jnp.pad(v, (0, FLAT - v.shape[0]))

    rows = [jnp.tile(b_qk, (1, S)), b_vo, g1, be1, b1, b2, g2, be2, bm1, bm2]
    rows = [row(r) for r in rows] + [jnp.zeros((FLAT,), jnp.float32)] * (VEC_ROWS - len(rows))
    p["vec"] = jnp.stack(rows, axis=0)                                # (16, 256) f32
    return p


if __name__ == "__main__":
    key = jax.random.PRNGKey(0)
    kx, kp = jax.random.split(key)
    B = 2
    # input as the PyTorch module would receive it before .view(B, -1, node_length)
    x = jax.random.normal(kx, (B, SEQ * D_MODEL), dtype=jnp.float32)
    params = init_params(kp)

    out = encoder_former_forward(x, params)
    out = jax.block_until_ready(out)
    assert out.shape == (B, MLP2) and out.dtype == jnp.float32
    assert bool(jnp.all(jnp.isfinite(out)))
    print("KERNEL_OK")
</pallas_src>

<mosaic_0001>
module attributes {stable_mosaic.version = 11 : i64} {
  func.func @encoder_former_kernel(%arg0: i32, %arg1: memref<8x256xbf16, #tpu.memory_space<vmem>>, %arg2: memref<32x256xbf16, #tpu.memory_space<vmem>>, %arg3: memref<256x8xbf16, #tpu.memory_space<vmem>>, %arg4: memref<8x256xbf16, #tpu.memory_space<vmem>>, %arg5: memref<256x32xbf16, #tpu.memory_space<vmem>>, %arg6: memref<32x64xbf16, #tpu.memory_space<vmem>>, %arg7: memref<64x32xbf16, #tpu.memory_space<vmem>>, %arg8: memref<32x128xbf16, #tpu.memory_space<vmem>>, %arg9: memref<128x128xbf16, #tpu.memory_space<vmem>>, %arg10: memref<16x256xf32, #tpu.memory_space<vmem>>, %arg11: memref<8x128xbf16, #tpu.memory_space<vmem>>) attributes {dimension_semantics = [#tpu.dimension_semantics<parallel>], iteration_bounds = array<i64: 2>, scalar_prefetch = 0 : i64, scratch_operands = 0 : i64, tpu.core_type = #tpu.core_type<tc>, window_params = [{transform_indices = @transform_0, window_bounds = array<i64: 8, 256>}, {pipeline_mode = #tpu.pipeline_mode<synchronous>, transform_indices = @transform_1, window_bounds = array<i64: 32, 256>}, {pipeline_mode = #tpu.pipeline_mode<synchronous>, transform_indices = @transform_2, window_bounds = array<i64: 256, 8>}, {pipeline_mode = #tpu.pipeline_mode<synchronous>, transform_indices = @transform_3, window_bounds = array<i64: 8, 256>}, {pipeline_mode = #tpu.pipeline_mode<synchronous>, transform_indices = @transform_4, window_bounds = array<i64: 256, 32>}, {pipeline_mode = #tpu.pipeline_mode<synchronous>, transform_indices = @transform_5, window_bounds = array<i64: 32, 64>}, {pipeline_mode = #tpu.pipeline_mode<synchronous>, transform_indices = @transform_6, window_bounds = array<i64: 64, 32>}, {pipeline_mode = #tpu.pipeline_mode<synchronous>, transform_indices = @transform_7, window_bounds = array<i64: 32, 128>}, {pipeline_mode = #tpu.pipeline_mode<synchronous>, transform_indices = @transform_8, window_bounds = array<i64: 128, 128>}, {pipeline_mode = #tpu.pipeline_mode<synchronous>, transform_indices = @transform_9, window_bounds = array<i64: 16, 256>}, {transform_indices = @transform_10, window_bounds = array<i64: 8, 128>}]} {
    %c0 = arith.constant 0 : index
    %c0_0 = arith.constant 0 : index
    %0 = vector.load %arg1[%c0, %c0_0] : memref<8x256xbf16, #tpu.memory_space<vmem>>, vector<8x256xbf16>
    %c0_1 = arith.constant 0 : index
    %c0_2 = arith.constant 0 : index
    %1 = vector.load %arg10[%c0_1, %c0_2] : memref<16x256xf32, #tpu.memory_space<vmem>>, vector<16x256xf32>
    %2 = vector.extract_strided_slice %1 {offsets = [0, 0], sizes = [1, 256], strides = [1, 1]} : vector<16x256xf32> to vector<1x256xf32>
    %3 = vector.extract_strided_slice %1 {offsets = [1, 0], sizes = [1, 32], strides = [1, 1]} : vector<16x256xf32> to vector<1x32xf32>
    %4 = vector.extract_strided_slice %1 {offsets = [2, 0], sizes = [1, 32], strides = [1, 1]} : vector<16x256xf32> to vector<1x32xf32>
    %5 = vector.extract_strided_slice %1 {offsets = [3, 0], sizes = [1, 32], strides = [1, 1]} : vector<16x256xf32> to vector<1x32xf32>
    %6 = vector.extract_strided_slice %1 {offsets = [4, 0], sizes = [1, 64], strides = [1, 1]} : vector<16x256xf32> to vector<1x64xf32>
    %7 = vector.extract_strided_slice %1 {offsets = [5, 0], sizes = [1, 32], strides = [1, 1]} : vector<16x256xf32> to vector<1x32xf32>
    %8 = vector.extract_strided_slice %1 {offsets = [6, 0], sizes = [1, 32], strides = [1, 1]} : vector<16x256xf32> to vector<1x32xf32>
    %9 = vector.extract_strided_slice %1 {offsets = [7, 0], sizes = [1, 32], strides = [1, 1]} : vector<16x256xf32> to vector<1x32xf32>
    %10 = vector.extract_strided_slice %1 {offsets = [8, 0], sizes = [1, 128], strides = [1, 1]} : vector<16x256xf32> to vector<1x128xf32>
    %11 = vector.extract_strided_slice %1 {offsets = [9, 0], sizes = [1, 128], strides = [1, 1]} : vector<16x256xf32> to vector<1x128xf32>
    %12 = vector.extract_strided_slice %0 {offsets = [0, 0], sizes = [8, 32], strides = [1, 1]} : vector<8x256xbf16> to vector<8x32xbf16>
    %13 = arith.extf %12 : vector<8x32xbf16> to vector<8x32xf32>
    %c0_3 = arith.constant 0 : index
    %c0_4 = arith.constant 0 : index
    %14 = vector.load %arg2[%c0_3, %c0_4] : memref<32x256xbf16, #tpu.memory_space<vmem>>, vector<32x256xbf16>
    %cst = arith.constant dense<0.000000e+00> : vector<8x256xf32>
    %15 = tpu.matmul %12, %14, %cst {dimension_numbers = #tpu.dot_dimension_numbers<[1], [0], [0], [1], [0, 0, 1, 1], [], []>} : vector<8x32xbf16>, vector<32x256xbf16>, vector<8x256xf32> -> vector<8x256xf32>
    %16 = vector.broadcast %2 : vector<1x256xf32> to vector<8x256xf32>
    %17 = arith.addf %15, %16 : vector<8x256xf32>
    %18 = arith.truncf %17 : vector<8x256xf32> to vector<8x256xbf16>
    %19 = arith.mulf %18, %0 : vector<8x256xbf16>
    %c0_5 = arith.constant 0 : index
    %c0_6 = arith.constant 0 : index
    %20 = vector.load %arg3[%c0_5, %c0_6] : memref<256x8xbf16, #tpu.memory_space<vmem>>, vector<256x8xbf16>
    %cst_7 = arith.constant dense<0.000000e+00> : vector<8x8xf32>
    %21 = tpu.matmul %19, %20, %cst_7 {dimension_numbers = #tpu.dot_dimension_numbers<[1], [0], [0], [1], [0, 0, 1, 1], [], []>} : vector<8x256xbf16>, vector<256x8xbf16>, vector<8x8xf32> -> vector<8x8xf32>
    %cst_8 = arith.constant dense<0xFF800000> : vector<8xf32>
    %22 = vector.multi_reduction <maximumf>, %21, %cst_8 [1] : vector<8x8xf32> to vector<8xf32>
    %23 = vector.shape_cast %22 : vector<8xf32> to vector<8x1xf32>
    %24 = vector.broadcast %23 : vector<8x1xf32> to vector<8x8xf32>
    %25 = arith.subf %21, %24 : vector<8x8xf32>
    %26 = math.exp %25 : vector<8x8xf32>
    %cst_9 = arith.constant dense<0.000000e+00> : vector<8xf32>
    %27 = vector.multi_reduction <add>, %26, %cst_9 [1] : vector<8x8xf32> to vector<8xf32>
    %28 = vector.shape_cast %27 : vector<8xf32> to vector<8x1xf32>
    %29 = vector.broadcast %28 : vector<8x1xf32> to vector<8x8xf32>
    %30 = arith.divf %26, %29 : vector<8x8xf32>
    %31 = arith.truncf %30 : vector<8x8xf32> to vector<8x8xbf16>
    %c0_10 = arith.constant 0 : index
    %c0_11 = arith.constant 0 : index
    %32 = vector.load %arg4[%c0_10, %c0_11] : memref<8x256xbf16, #tpu.memory_space<vmem>>, vector<8x256xbf16>
    %cst_12 = arith.constant dense<0.000000e+00> : vector<8x256xf32>
    %33 = tpu.matmul %31, %32, %cst_12 {dimension_numbers = #tpu.dot_dimension_numbers<[1], [0], [0], [1], [0, 0, 1, 1], [], []>} : vector<8x8xbf16>, vector<8x256xbf16>, vector<8x256xf32> -> vector<8x256xf32>
    %34 = arith.truncf %33 : vector<8x256xf32> to vector<8x256xbf16>
    %35 = arith.mulf %34, %0 : vector<8x256xbf16>
    %c0_13 = arith.constant 0 : index
    %c0_14 = arith.constant 0 : index
    %36 = vector.load %arg5[%c0_13, %c0_14] : memref<256x32xbf16, #tpu.memory_space<vmem>>, vector<256x32xbf16>
    %cst_15 = arith.constant dense<0.000000e+00> : vector<8x32xf32>
    %37 = tpu.matmul %35, %36, %cst_15 {dimension_numbers = #tpu.dot_dimension_numbers<[1], [0], [0], [1], [0, 0, 1, 1], [], []>} : vector<8x256xbf16>, vector<256x32xbf16>, vector<8x32xf32> -> vector<8x32xf32>
    %38 = vector.broadcast %3 : vector<1x32xf32> to vector<8x32xf32>
    %39 = arith.addf %37, %38 : vector<8x32xf32>
    %40 = arith.addf %13, %39 : vector<8x32xf32>
    %cst_16 = arith.constant dense<0.000000e+00> : vector<8xf32>
    %41 = vector.multi_reduction <add>, %40, %cst_16 [1] : vector<8x32xf32> to vector<8xf32>
    %42 = vector.shape_cast %41 : vector<8xf32> to vector<8x1xf32>
    %cst_17 = arith.constant 3.200000e+01 : f32
    %43 = vector.broadcast %cst_17 : f32 to vector<8x1xf32>
    %44 = arith.divf %42, %43 : vector<8x1xf32>
    %45 = vector.broadcast %44 : vector<8x1xf32> to vector<8x32xf32>
    %46 = arith.subf %40, %45 : vector<8x32xf32>
    %47 = arith.mulf %46, %46 : vector<8x32xf32>
    %cst_18 = arith.constant dense<0.000000e+00> : vector<8xf32>
    %48 = vector.multi_reduction <add>, %47, %cst_18 [1] : vector<8x32xf32> to vector<8xf32>
    %49 = vector.shape_cast %48 : vector<8xf32> to vector<8x1xf32>
    %cst_19 = arith.constant 3.200000e+01 : f32
    %50 = vector.broadcast %cst_19 : f32 to vector<8x1xf32>
    %51 = arith.divf %49, %50 : vector<8x1xf32>
    %52 = vector.broadcast %44 : vector<8x1xf32> to vector<8x32xf32>
    %53 = arith.subf %40, %52 : vector<8x32xf32>
    %cst_20 = arith.constant 9.99999974E-6 : f32
    %54 = vector.broadcast %cst_20 : f32 to vector<8x1xf32>
    %55 = arith.addf %51, %54 : vector<8x1xf32>
    %56 = math.rsqrt %55 : vector<8x1xf32>
    %57 = vector.broadcast %56 : vector<8x1xf32> to vector<8x32xf32>
    %58 = arith.mulf %53, %57 : vector<8x32xf32>
    %59 = vector.broadcast %4 : vector<1x32xf32> to vector<8x32xf32>
    %60 = arith.mulf %58, %59 : vector<8x32xf32>
    %61 = vector.broadcast %5 : vector<1x32xf32> to vector<8x32xf32>
    %62 = arith.addf %60, %61 : vector<8x32xf32>
    %63 = arith.truncf %62 : vector<8x32xf32> to vector<8x32xbf16>
    %c0_21 = arith.constant 0 : index
    %c0_22 = arith.constant 0 : index
    %64 = vector.load %arg6[%c0_21, %c0_22] : memref<32x64xbf16, #tpu.memory_space<vmem>>, vector<32x64xbf16>
    %cst_23 = arith.constant dense<0.000000e+00> : vector<8x64xf32>
    %65 = tpu.matmul %63, %64, %cst_23 {dimension_numbers = #tpu.dot_dimension_numbers<[1], [0], [0], [1], [0, 0, 1, 1], [], []>} : vector<8x32xbf16>, vector<32x64xbf16>, vector<8x64xf32> -> vector<8x64xf32>
    %66 = vector.broadcast %6 : vector<1x64xf32> to vector<8x64xf32>
    %67 = arith.addf %65, %66 : vector<8x64xf32>
    %68 = arith.mulf %67, %67 : vector<8x64xf32>
    %69 = arith.mulf %67, %68 : vector<8x64xf32>
    %cst_24 = arith.constant 4.471500e-02 : f32
    %70 = vector.broadcast %cst_24 : f32 to vector<8x64xf32>
    %71 = arith.mulf %70, %69 : vector<8x64xf32>
    %72 = arith.addf %67, %71 : vector<8x64xf32>
    %cst_25 = arith.constant 0.797884583 : f32
    %73 = vector.broadcast %cst_25 : f32 to vector<8x64xf32>
    %74 = arith.mulf %73, %72 : vector<8x64xf32>
    %75 = math.tanh %74 : vector<8x64xf32>
    %cst_26 = arith.constant 1.000000e+00 : f32
    %76 = vector.broadcast %cst_26 : f32 to vector<8x64xf32>
    %77 = arith.addf %76, %75 : vector<8x64xf32>
    %cst_27 = arith.constant 5.000000e-01 : f32
    %78 = vector.broadcast %cst_27 : f32 to vector<8x64xf32>
    %79 = arith.mulf %78, %77 : vector<8x64xf32>
    %80 = arith.mulf %67, %79 : vector<8x64xf32>
    %81 = arith.truncf %80 : vector<8x64xf32> to vector<8x64xbf16>
    %c0_28 = arith.constant 0 : index
    %c0_29 = arith.constant 0 : index
    %82 = vector.load %arg7[%c0_28, %c0_29] : memref<64x32xbf16, #tpu.memory_space<vmem>>, vector<64x32xbf16>
    %cst_30 = arith.constant dense<0.000000e+00> : vector<8x32xf32>
    %83 = tpu.matmul %81, %82, %cst_30 {dimension_numbers = #tpu.dot_dimension_numbers<[1], [0], [0], [1], [0, 0, 1, 1], [], []>} : vector<8x64xbf16>, vector<64x32xbf16>, vector<8x32xf32> -> vector<8x32xf32>
    %84 = vector.broadcast %7 : vector<1x32xf32> to vector<8x32xf32>
    %85 = arith.addf %83, %84 : vector<8x32xf32>
    %86 = arith.addf %62, %85 : vector<8x32xf32>
    %cst_31 = arith.constant dense<0.000000e+00> : vector<8xf32>
    %87 = vector.multi_reduction <add>, %86, %cst_31 [1] : vector<8x32xf32> to vector<8xf32>
    %88 = vector.shape_cast %87 : vector<8xf32> to vector<8x1xf32>
    %cst_32 = arith.constant 3.200000e+01 : f32
    %89 = vector.broadcast %cst_32 : f32 to vector<8x1xf32>
    %90 = arith.divf %88, %89 : vector<8x1xf32>
    %91 = vector.broadcast %90 : vector<8x1xf32> to vector<8x32xf32>
    %92 = arith.subf %86, %91 : vector<8x32xf32>
    %93 = arith.mulf %92, %92 : vector<8x32xf32>
    %cst_33 = arith.constant dense<0.000000e+00> : vector<8xf32>
    %94 = vector.multi_reduction <add>, %93, %cst_33 [1] : vector<8x32xf32> to vector<8xf32>
    %95 = vector.shape_cast %94 : vector<8xf32> to vector<8x1xf32>
    %cst_34 = arith.constant 3.200000e+01 : f32
    %96 = vector.broadcast %cst_34 : f32 to vector<8x1xf32>
    %97 = arith.divf %95, %96 : vector<8x1xf32>
    %98 = vector.broadcast %90 : vector<8x1xf32> to vector<8x32xf32>
    %99 = arith.subf %86, %98 : vector<8x32xf32>
    %cst_35 = arith.constant 9.99999974E-6 : f32
    %100 = vector.broadcast %cst_35 : f32 to vector<8x1xf32>
    %101 = arith.addf %97, %100 : vector<8x1xf32>
    %102 = math.rsqrt %101 : vector<8x1xf32>
    %103 = vector.broadcast %102 : vector<8x1xf32> to vector<8x32xf32>
    %104 = arith.mulf %99, %103 : vector<8x32xf32>
    %105 = vector.broadcast %8 : vector<1x32xf32> to vector<8x32xf32>
    %106 = arith.mulf %104, %105 : vector<8x32xf32>
    %107 = vector.broadcast %9 : vector<1x32xf32> to vector<8x32xf32>
    %108 = arith.addf %106, %107 : vector<8x32xf32>
    %109 = arith.truncf %108 : vector<8x32xf32> to vector<8x32xbf16>
    %c0_36 = arith.constant 0 : index
    %c0_37 = arith.constant 0 : index
    %110 = vector.load %arg8[%c0_36, %c0_37] : memref<32x128xbf16, #tpu.memory_space<vmem>>, vector<32x128xbf16>
    %cst_38 = arith.constant dense<0.000000e+00> : vector<8x128xf32>
    %111 = tpu.matmul %109, %110, %cst_38 {dimension_numbers = #tpu.dot_dimension_numbers<[1], [0], [0], [1], [0, 0, 1, 1], [], []>} : vector<8x32xbf16>, vector<32x128xbf16>, vector<8x128xf32> -> vector<8x128xf32>
    %112 = vector.broadcast %10 : vector<1x128xf32> to vector<8x128xf32>
    %113 = arith.addf %111, %112 : vector<8x128xf32>
    %cst_39 = arith.constant 0.000000e+00 : f32
    %114 = vector.broadcast %cst_39 : f32 to vector<8x128xf32>
    %115 = arith.maximumf %113, %114 : vector<8x128xf32>
    %116 = arith.truncf %115 : vector<8x128xf32> to vector<8x128xbf16>
    %c0_40 = arith.constant 0 : index
    %c0_41 = arith.constant 0 : index
    %117 = vector.load %arg9[%c0_40, %c0_41] : memref<128x128xbf16, #tpu.memory_space<vmem>>, vector<128x128xbf16>
    %cst_42 = arith.constant dense<0.000000e+00> : vector<8x128xf32>
    %118 = tpu.matmul %116, %117, %cst_42 {dimension_numbers = #tpu.dot_dimension_numbers<[1], [0], [0], [1], [0, 0, 1, 1], [], []>} : vector<8x128xbf16>, vector<128x128xbf16>, vector<8x128xf32> -> vector<8x128xf32>
    %119 = vector.broadcast %11 : vector<1x128xf32> to vector<8x128xf32>
    %120 = arith.addf %118, %119 : vector<8x128xf32>
    %cst_43 = arith.constant 0.000000e+00 : f32
    %121 = vector.broadcast %cst_43 : f32 to vector<8x128xf32>
    %122 = arith.maximumf %120, %121 : vector<8x128xf32>
    %123 = arith.truncf %122 : vector<8x128xf32> to vector<8x128xbf16>
    %c0_44 = arith.constant 0 : index
    %c0_45 = arith.constant 0 : index
    %124 = vector.load %arg11[%c0_44, %c0_45] : memref<8x128xbf16, #tpu.memory_space<vmem>>, vector<8x128xbf16>
    tpu.vector_store %arg11[%c0_44, %c0_45], %123 {strides = array<i32>} : memref<8x128xbf16, #tpu.memory_space<vmem>>, vector<8x128xbf16>,
    return
  }
  func.func @transform_0(%arg0: i32) -> (i32, i32) {
    %c0_i32 = arith.constant 0 : i32
    %c0_i32_0 = arith.constant 0 : i32
    return %arg0, %c0_i32 : i32, i32
  }
  func.func @transform_1(%arg0: i32) -> (i32, i32) {
    %c0_i32 = arith.constant 0 : i32
    %c0_i32_0 = arith.constant 0 : i32
    %c0_i32_1 = arith.constant 0 : i32
    return %c0_i32, %c0_i32_0 : i32, i32
  }
  func.func @transform_2(%arg0: i32) -> (i32, i32) {
    %c0_i32 = arith.constant 0 : i32
    %c0_i32_0 = arith.constant 0 : i32
    %c0_i32_1 = arith.constant 0 : i32
    return %c0_i32, %c0_i32_0 : i32, i32
  }
  func.func @transform_3(%arg0: i32) -> (i32, i32) {
    %c0_i32 = arith.constant 0 : i32
    %c0_i32_0 = arith.constant 0 : i32
    %c0_i32_1 = arith.constant 0 : i32
    return %c0_i32, %c0_i32_0 : i32, i32
  }
  func.func @transform_4(%arg0: i32) -> (i32, i32) {
    %c0_i32 = arith.constant 0 : i32
    %c0_i32_0 = arith.constant 0 : i32
    %c0_i32_1 = arith.constant 0 : i32
    return %c0_i32, %c0_i32_0 : i32, i32
  }
  func.func @transform_5(%arg0: i32) -> (i32, i32) {
    %c0_i32 = arith.constant 0 : i32
    %c0_i32_0 = arith.constant 0 : i32
    %c0_i32_1 = arith.constant 0 : i32
    return %c0_i32, %c0_i32_0 : i32, i32
  }
  func.func @transform_6(%arg0: i32) -> (i32, i32) {
    %c0_i32 = arith.constant 0 : i32
    %c0_i32_0 = arith.constant 0 : i32
    %c0_i32_1 = arith.constant 0 : i32
    return %c0_i32, %c0_i32_0 : i32, i32
  }
  func.func @transform_7(%arg0: i32) -> (i32, i32) {
    %c0_i32 = arith.constant 0 : i32
    %c0_i32_0 = arith.constant 0 : i32
    %c0_i32_1 = arith.constant 0 : i32
    return %c0_i32, %c0_i32_0 : i32, i32
  }
  func.func @transform_8(%arg0: i32) -> (i32, i32) {
    %c0_i32 = arith.constant 0 : i32
    %c0_i32_0 = arith.constant 0 : i32
    %c0_i32_1 = arith.constant 0 : i32
    return %c0_i32, %c0_i32_0 : i32, i32
  }
  func.func @transform_9(%arg0: i32) -> (i32, i32) {
    %c0_i32 = arith.constant 0 : i32
    %c0_i32_0 = arith.constant 0 : i32
    %c0_i32_1 = arith.constant 0 : i32
    return %c0_i32, %c0_i32_0 : i32, i32
  }
  func.func @transform_10(%arg0: i32) -> (i32, i32) {
    %c0_i32 = arith.constant 0 : i32
    %c0_i32_0 = arith.constant 0 : i32
    return %arg0, %c0_i32 : i32, i32
  }
}

</mosaic_0001>

<bundles_post_ra>
// kernel: encoder_former_forward.1
= control target key start
LH: loop header
LB: loop body
LE: loop exit
PB: predicated region body
PF: predicated region fallthrough
CT: control target
= control target key end

     0   :  { %s1500_s13 = smov 0   ;;  %s1744_s0 = inlined_call_operand.vmem [shape: bf16[16,256], index: 0, kind: input, shape index: {}]   ;;  %s1745_s1 = inlined_call_operand.vmem [shape: bf16[32,256], index: 1, kind: input, shape index: {}]   ;;  %s1746_s2 = inlined_call_operand.vmem [shape: bf16[256,8], index: 2, kind: input, shape index: {}]   ;;  %s1747_s3 = inlined_call_operand.vmem [shape: bf16[8,256], index: 3, kind: input, shape index: {}]   ;;  %s1748_s4 = inlined_call_operand.vmem [shape: bf16[256,32], index: 4, kind: input, shape index: {}]   ;;  %s1749_s5 = inlined_call_operand.vmem [shape: bf16[32,64], index: 5, kind: input, shape index: {}]   ;;  %s1750_s6 = inlined_call_operand.vmem [shape: bf16[64,32], index: 6, kind: input, shape index: {}]   ;;  %s1751_s7 = inlined_call_operand.vmem [shape: bf16[32,128], index: 7, kind: input, shape index: {}]   ;;  %s1752_s8 = inlined_call_operand.vmem [shape: bf16[128,128], index: 8, kind: input, shape index: {}]   ;;  %s1753_s9 = inlined_call_operand.vmem [shape: f32[16,256], index: 9, kind: input, shape index: {}]   ;;  %s1754_s10 = inlined_call_operand.vmem [shape: bf16[16,128], index: 10, kind: output, shape index: {}]  }
   0x1 LB: > { %s1137_s14 = sadd.s32 4294967295, %s1442_s13   ;;  %p1141_p0 = scmp.ge.s32.totalorder %s1442_s13, 1  ;;  %s1442_s13 = sphi %s1500_s13, %s20_s13  }
   0x2   : > { %p312_p1 = scmp.lt.s32.totalorder %s1442_s13, 3 }
   0x4   : > { %p313_p2 = pnand %p1141_p0, %p312_p1 }
   0x5   : > { %p349_p3 = scmp.lt.s32.totalorder (!%p313_p2), %s1137_s14, 1 }
   0x6   : > { %316 = sbr.rel (%p313_p2) target bundleno = 1931 (0x78b), region = 60 }
   0xb   : > { %v1155_v0 = vld [vmem:[%s1745_s1 + $0x10] sm:$0xf]  ;;  %v1366_v1 = vld [vmem:[%s1745_s1 + $0x14] sm:$0xf0]  ;;  %v1365_v2 = vld [vmem:[%s1745_s1 + $0x14] sm:$0xf] }
   0xc   : > { %v1156_v3 = vor.u32 %v1366_v1, %v1155_v0  ;;  %v1157_v4 = vld [vmem:[%s1745_s1 + $0x18] sm:$0xf0]  ;;  %v1147_v5 = vld [vmem:[%s1745_s1] sm:$0xf]  ;;  %v1364_v6 = vld [vmem:[%s1745_s1 + $0x4] sm:$0xf0] }
   0xd   : > { %v1160_v7 = vor.u32 %v1365_v2, %v1157_v4  ;;  %v1363_v8 = vld [vmem:[%s1745_s1 + $0x4] sm:$0xf]  ;;  %v1149_v9 = vld [vmem:[%s1745_s1 + $0x8] sm:$0xf0]  ;;  %v1148_v10 = vor.u32 %v1364_v6, %v1147_v5  ;;  %v1374_v11 = vld [vmem:[%s1746_s2 + $0x38] sm:$0xff]  ;;  %s1756_s14 = smov (!%p349_p3, %s1137_s14), 1 }
   0xe   : > { %400 = vmatpush.bf16.msra.mxu0 %v1156_v3  ;;  %v1382_v12 = vld [vmem:[%s1746_s2 + $0x78] sm:$0xff]  ;;  %v1152_v13 = vor.u32 %v1363_v8, %v1149_v9  ;;  %556 = vmatpush.bf16.msra.mxu2 %v1374_v11  ;;  %v1373_v14 = vld [vmem:[%s1746_s2 + $0x30] sm:$0xff]  ;;  %s1362_s21 = sshll.u32 %s1756_s14, 3  ;;  %vm390_vm0 = vcmask 261120   ;;  %v1372_v17 = vld [vmem:[%s1746_s2 + $0x28] sm:$0xff]  ;;  %vm582_vm1 = vcmask 64512  }
   0xf   : > { %413 = vmatpush.bf16.msra.mxu1 %v1160_v7  ;;  %569 = vmatpush.bf16.msra.mxu3 %v1382_v12  ;;  %v1381_v15 = vld [vmem:[%s1746_s2 + $0x70] sm:$0xff]  ;;  %s353_s24 = scalar_lea.vmem %s1744_s0, %s1362_s21  ;;  %v1380_v18 = vld [vmem:[%s1746_s2 + $0x68] sm:$0xff]  ;;  %v1371_v19 = vld [vmem:[%s1746_s2 + $0x20] sm:$0xff]  ;;  %vm617_vm2 = vcmask 1043456   ;;  %vm923_vm11 = vcmask 523264   ;;  %s1144_s11 = sshll.u32 %s1756_s14, 2 }
  0x10   : > { %v1550_v16 = vld [vmem:[%s353_s24] sm:$0xff]  ;;  %v1370_v21 = vld [vmem:[%s1746_s2 + $0x18] sm:$0xff]  ;;  %v1369_v23 = vld [vmem:[%s1746_s2 + $0x10] sm:$0xff]  ;;  %s357_s16 = scalar_lea.vmem %s1754_s10, %s1144_s11 }
  0x11   : > { %v1379_v20 = vld [vmem:[%s1746_s2 + $0x60] sm:$0xff]  ;;  %v1378_v22 = vld [vmem:[%s1746_s2 + $0x58] sm:$0xff]  ;;  %v1377_v24 = vld [vmem:[%s1746_s2 + $0x50] sm:$0xff]  ;;  %v1602_v38 = vunpack.c.l.bf16 %v1550_v16  ;;  %v423_v39 = vunpack.c.h.bf16 %v1550_v16 }
  0x12   : > { %401 = vmatpush.bf16.msra.mxu0 %v1148_v10  ;;  %557 = vmatpush.bf16.msra.mxu2 %v1373_v14  ;;  %v1368_v25 = vld [vmem:[%s1746_s2 + $0x8] sm:$0xff]  ;;  %v1367_v27 = vld [vmem:[%s1746_s2] sm:$0xff]  ;;  %v1390_v2 = vld [vmem:[%s1748_s4 + $0x38] sm:$0xff] }
  0x13   : > { %414 = vmatpush.bf16.msra.mxu1 %v1152_v13  ;;  %570 = vmatpush.bf16.msra.mxu3 %v1381_v15  ;;  %v1376_v26 = vld [vmem:[%s1746_s2 + $0x48] sm:$0xff]  ;;  %v1375_v28 = vld [vmem:[%s1746_s2 + $0x40] sm:$0xff]  ;;  %v1398_v3 = vld [vmem:[%s1748_s4 + $0x78] sm:$0xff] }
  0x14   : > { %v1595_v29 = vld [vmem:[%s1753_s9] sm:$0xff]  ;;  %v361_v30 = vld [vmem:[%s1753_s9 + $0x8] sm:$0xff]  ;;  %v1389_v4 = vld [vmem:[%s1748_s4 + $0x30] sm:$0xff] }
  0x15   : > { %1161 = vmatmul.msk.bf16.vlgmr.msra.gmra.mxu0 %vm390_vm0, %v1550_v16  ;;  %v368_v31 = vperm.slane %v1595_v29, 0  ;;  %v369_v32 = vperm.slane %v361_v30, 0  ;;  %v608_v59 = vld [vmem:[%s1747_s3] sm:$0xff]  ;;  %v1397_v5 = vld [vmem:[%s1748_s4 + $0x70] sm:$0xff]  ;;  %v1388_v6 = vld [vmem:[%s1748_s4 + $0x28] sm:$0xff] }
  0x16   : > { %1162 = vmatmul.msk.bf16.vlgmr.msra.gmra.mxu1 %vm390_vm0, %v1550_v16  ;;  %558 = vmatpush.bf16.msra.mxu2 %v1372_v17  ;;  %v610_v60 = vunpack.c.l.b16 %v608_v59  ;;  %v611_v61 = vunpack.c.h.b16 %v608_v59  ;;  %v1396_v7 = vld [vmem:[%s1748_s4 + $0x68] sm:$0xff]  ;;  %v1387_v9 = vld [vmem:[%s1748_s4 + $0x20] sm:$0xff]  ;;  %v1386_v11 = vld [vmem:[%s1748_s4 + $0x18] sm:$0xff]  ;;  %v1444_v16 = vmov 32.0  }
  0x17   : > { %571 = vmatpush.bf16.msra.mxu3 %v1380_v18  ;;  %v1395_v10 = vld [vmem:[%s1748_s4 + $0x60] sm:$0xff]  ;;  %v1394_v12 = vld [vmem:[%s1748_s4 + $0x58] sm:$0xff]  ;;  %v1385_v15 = vld [vmem:[%s1748_s4 + $0x10] sm:$0xff] }
  0x18   : > { %v612_v62 = vpack.c.b16 %v610_v60, %v610_v60  ;;  %v613_v63 = vpack.c.b16 %v611_v61, %v611_v61  ;;  %v1393_v17 = vld [vmem:[%s1748_s4 + $0x50] sm:$0xff]  ;;  %v1392_v30 = vld [vmem:[%s1748_s4 + $0x48] sm:$0xff] }
  0x1a   : > { %559 = vmatpush.bf16.msra.mxu2 %v1371_v19  ;;  %v619_v0 = vsel %vm617_vm2, %v612_v62, 0  ;;  %v622_v1 = vsel %vm617_vm2, %v613_v63, 0 }
  0x1b   : > { %572 = vmatpush.bf16.msra.mxu3 %v1379_v20  ;;  %631 = vmatpush.bf16.msrb.mxu0 %v619_v0  ;;  %v1400_v0 = vld [vmem:[%s1749_s5 + $0x8] sm:$0xff] }
  0x1c   : > { %644 = vmatpush.bf16.msrb.mxu1 %v622_v1  ;;  %v1399_v1 = vld [vmem:[%s1749_s5] sm:$0xff] }
  0x1e   : > { %560 = vmatpush.bf16.msra.mxu2 %v1370_v21 }
  0x1f   : > { %573 = vmatpush.bf16.msra.mxu3 %v1378_v22  ;;  %786 = vmatpush.bf16.msra.mxu0 %v1390_v2 }
  0x20   : > { %799 = vmatpush.bf16.msra.mxu1 %v1398_v3 }
  0x22   : > { %561 = vmatpush.bf16.msra.mxu2 %v1369_v23 }
  0x23   : > { %574 = vmatpush.bf16.msra.mxu3 %v1377_v24  ;;  %787 = vmatpush.bf16.msra.mxu0 %v1389_v4 }
  0x24   : > { %800 = vmatpush.bf16.msra.mxu1 %v1397_v5 }
  0x26   : > { %562 = vmatpush.bf16.msra.mxu2 %v1368_v25 }
  0x27   : > { %575 = vmatpush.bf16.msra.mxu3 %v1376_v26  ;;  %788 = vmatpush.bf16.msra.mxu0 %v1388_v6 }
  0x28   : > { %801 = vmatpush.bf16.msra.mxu1 %v1396_v7 }
  0x2a   : > { %563 = vmatpush.bf16.msra.mxu2 %v1367_v27 }
  0x2b   : > { %576 = vmatpush.bf16.msra.mxu3 %v1375_v28  ;;  %789 = vmatpush.bf16.msra.mxu0 %v1387_v9  ;;  %v1384_v28 = vld [vmem:[%s1748_s4 + $0x8] sm:$0xff] }
  0x2c   : > { %802 = vmatpush.bf16.msra.mxu1 %v1395_v10 }
  0x2e   : > { %873 = vmatpush.bf16.msrb.mxu2 %v1400_v0 }
  0x2f   : > { %790 = vmatpush.bf16.msra.mxu0 %v1386_v11  ;;  %v842_v11 = vperm.slane %v1595_v29, 2 }
  0x30   : > { %803 = vmatpush.bf16.msra.mxu1 %v1394_v12 }
  0x32   : > { %874 = vmatpush.bf16.msrb.mxu2 %v1399_v1  ;;  %v963_v1 = vperm.slane %v1595_v29, 6 }
  0x33   : > { %791 = vmatpush.bf16.msra.mxu0 %v1385_v15 }
  0x34   : > { %804 = vmatpush.bf16.msra.mxu1 %v1393_v17 }
  0x37   : > { %792 = vmatpush.bf16.msra.mxu0 %v1384_v28 }
  0x38   : > { %805 = vmatpush.bf16.msra.mxu1 %v1392_v30 }
  0x92   : > { %v403_v33 = vpop.f32.mrf.mxu0 }
  0x93   : > { %v404_v34 = vadd.f32 %v403_v33, %v368_v31  ;;  %v416_v35 = vpop.f32.mrf.mxu1  ;;  %v1383_v31 = vld [vmem:[%s1748_s4] sm:$0xff] }
  0x94   : > { %v417_v36 = vadd.f32 %v416_v35, %v369_v32  ;;  %v1391_v32 = vld [vmem:[%s1748_s4 + $0x40] sm:$0xff]  ;;  %793 = vmatpush.bf16.msra.mxu0 %v1383_v31 }
  0x95   : > { %806 = vmatpush.bf16.msra.mxu1 %v1391_v32 }
  0x96   : > { %v420_v37 = vpack.c.bf16 %v417_v36, %v404_v34 }
  0x98   : > { %v421_v40 = vunpack.c.l.bf16 %v420_v37  ;;  %v422_v41 = vunpack.c.h.bf16 %v420_v37 }
  0x9a   : > { %v405_v42 = vpop.f32.mrf.mxu0  ;;  %v424_v43 = vmul.f32 %v421_v40, %v1602_v38  ;;  %v425_v44 = vmul.f32 %v423_v39, %v422_v41 }
  0x9b   : > { %v418_v45 = vpop.f32.mrf.mxu1 }
  0x9c   : > { %v426_v46 = vpack.c.bf16 %v424_v43, %v424_v43  ;;  %v427_v47 = vpack.c.bf16 %v425_v44, %v425_v44 }
  0x9e   : > { %564 = vmatmul.bf16.vlgmr.msra.gmra.mxu2 %v426_v46  ;;  %577 = vmatmul.bf16.vlgmr.msra.gmra.mxu3 %v427_v47  ;;  %v689_v46 = vperm.slane %v1595_v29, 1 }
 0x121   : > { %v565_v48 = vpop.f32.mrf.mxu2  ;;  %v578_v49 = vpop.f32.mrf.mxu3 }
 0x122   : > { %v579_v50 = vadd.f32 %v578_v49, %v565_v48 }
 0x124   : > { %v583_v51 = vsel %vm582_vm1, %v579_v50, -inf }
 0x125   : > { %584 = vmax.xlane.f32.xlu0 %v583_v51 }
 0x129   : > { %v567_v52 = vpop.f32.mrf.mxu2  ;;  %v580_v53 = vpop.f32.mrf.mxu3 }
 0x198   : > { %v585_v54 = vpop.xlane.xlu0 %584 }
 0x199   : > { %v586_v55 = vsub.f32 %v579_v50, %v585_v54 }
 0x19b   : > { %v587_v56 = vmul.f32 1.442695, %v586_v55 }
 0x19d   : > { %1424 = vpow2.f32 %v587_v56 }
 0x1a3   : > { %v1425_v57 = vpop.eup %1424 }
 0x1a4   : > { %v589_v58 = vsel %vm582_vm1, %v1425_v57, 0.0 }
 0x1a5   : > { %590 = vadd.xlane.f32.xlu0 %v589_v58 }
 0x218   : > { %v591_v8 = vpop.xlane.xlu0 %590 }
 0x219   : > { %1426 = vrcp.f32 %v591_v8  ;;  %v603_v19 = vand.u32 2147483648, %v591_v8  ;;  %v601_v21 = vand.u32 2147483647, %v591_v8  ;;  %vm597_vm4 = vweird.f32 %v591_v8 }
 0x21a   : > { %1428 = vrcp.f32 %v1444_v16 }
 0x21b   : > { %v604_v23 = vor.u32 1.1754944e-38, %v603_v19  ;;  %vm602_vm6 = vcmp.eq.f32.partialorder %v601_v21, 8.507059e+37  ;;  %v1404_v19 = vld [vmem:[%s1750_s6 + $0x18] sm:$0xff]  ;;  %v1402_v21 = vld [vmem:[%s1750_s6 + $0x8] sm:$0xff] }
 0x21f   : > { %v1427_v13 = vpop.eup %1426 }
 0x220   : > { %v593_v14 = vmul.f32 %v1427_v13, %v591_v8  ;;  %vm598_vm3 = vweird.f32 %v1427_v13 }
 0x221   : > { %vm599_vm5 = vmor %vm597_vm4, %vm598_vm3 }
 0x222   : > { %v594_v18 = vsub.f32 1.0, %v593_v14  ;;  %v844_v14 = vperm.slane %v1595_v29, 3 }
 0x224   : > { %v595_v20 = vmul.f32 %v1427_v13, %v594_v18 }
 0x226   : > { %v596_v22 = vadd.f32 %v1427_v13, %v595_v20  ;;  %v1403_v20 = vld [vmem:[%s1750_s6 + $0x10] sm:$0xff] }
 0x228   : > { %v600_v24 = vsel %vm599_vm5, %v1427_v13, %v596_v22  ;;  %v1401_v22 = vld [vmem:[%s1750_s6] sm:$0xff] }
 0x229   : > { %v605_v25 = vsel %vm602_vm6, %v604_v23, %v600_v24  ;;  %v851_v23 = vperm.slane %v1595_v29, 4 }
 0x22a   : > { %v606_v26 = vmul.f32 %v1425_v57, %v605_v25 }
 0x22c   : > { %v607_v27 = vpack.c.bf16 %v606_v26, %v606_v26 }
 0x22e   : > { %1227 = vmatmul.msk.bf16.vlgmr.msrb.gmra.mxu0 %vm582_vm1, %v607_v27  ;;  %1228 = vmatmul.msk.bf16.vlgmr.msrb.gmra.mxu1 %vm582_vm1, %v607_v27 }
 0x22f   : > { %931 = vmatpush.bf16.msrb.mxu0 %v1404_v19 }
 0x233   : > { %932 = vmatpush.bf16.msrb.mxu0 %v1403_v20 }
 0x237   : > { %933 = vmatpush.bf16.msrb.mxu0 %v1402_v21 }
 0x23b   : > { %934 = vmatpush.bf16.msrb.mxu0 %v1401_v22 }
 0x2ab   : > { %v633_v33 = vpop.f32.mrf.mxu0  ;;  %v646_v34 = vpop.f32.mrf.mxu1 }
 0x2ac   : > { %v650_v35 = vpack.c.bf16 %v646_v34, %v633_v33 }
 0x2ae   : > { %v651_v36 = vunpack.c.l.bf16 %v650_v35  ;;  %v652_v37 = vunpack.c.h.bf16 %v650_v35 }
 0x2b0   : > { %v653_v40 = vmul.f32 %v651_v36, %v1602_v38  ;;  %v654_v41 = vmul.f32 %v652_v37, %v423_v39  ;;  %v1429_v39 = vpop.eup %1428 }
 0x2b1   : > { %v817_v55 = vmul.f32 32.0, %v1429_v39  ;;  %vm821_vm7 = vweird.f32 %v1429_v39 }
 0x2b2   : > { %v655_v42 = vpack.c.bf16 %v653_v40, %v653_v40  ;;  %v656_v43 = vpack.c.bf16 %v654_v41, %v654_v41  ;;  %v898_v40 = vperm.slane %v1595_v29, 5 }
 0x2b3   : > { %v635_v44 = vpop.f32.mrf.mxu0  ;;  %v648_v45 = vpop.f32.mrf.mxu1  ;;  %v818_v56 = vsub.f32 1.0, %v817_v55 }
 0x2b4   : > { %794 = vmatmul.bf16.vlgmr.msra.gmra.mxu0 %v655_v42  ;;  %807 = vmatmul.bf16.vlgmr.msra.gmra.mxu1 %v656_v43 }
 0x2b5   : > { %v819_v57 = vmul.f32 %v1429_v39, %v818_v56  ;;  %v1412_v56 = vld [vmem:[%s1752_s8 + $0x28] sm:$0xff] }
 0x2b7   : > { %v820_v58 = vadd.f32 %v1429_v39, %v819_v57  ;;  %v1411_v57 = vld [vmem:[%s1752_s8 + $0x20] sm:$0xff] }
 0x2b9   : > { %v1669_v59 = vsel %vm821_vm7, %v1429_v39, %v820_v58  ;;  %v1413_v39 = vld [vmem:[%s1752_s8 + $0x30] sm:$0xff] }
 0x331   : > { %v795_v47 = vpop.f32.mrf.mxu0  ;;  %v808_v48 = vpop.f32.mrf.mxu1 }
 0x332   : > { %v796_v49 = vadd.f32 %v795_v47, %v689_v46 }
 0x334   : > { %v809_v50 = vadd.f32 %v808_v48, %v796_v49 }
 0x336   : > { %v812_v51 = vadd.f32 %v809_v50, %v1602_v38 }
 0x338   : > { %v813_v52 = vsel %vm390_vm0, %v812_v51, 0.0 }
 0x339   : > { %v797_v53 = vpop.f32.mrf.mxu0  ;;  %v810_v54 = vpop.f32.mrf.mxu1  ;;  %814 = vadd.xlane.f32.xlu1 %v813_v52  ;;  %v1405_v52 = vld [vmem:[%s1751_s7] sm:$0xff] }
 0x33a   : > { %v1414_v53 = vld [vmem:[%s1752_s8 + $0x38] sm:$0xff] }
 0x33b   : > { %1068 = vmatpush.bf16.msrb.mxu3 %v1414_v53 }
 0x33f   : > { %1069 = vmatpush.bf16.msrb.mxu3 %v1413_v39 }
 0x343   : > { %1070 = vmatpush.bf16.msrb.mxu3 %v1412_v56 }
 0x347   : > { %1071 = vmatpush.bf16.msrb.mxu3 %v1411_v57 }
 0x3ac   : > { %v815_v60 = vpop.xlane.xlu1 %814 }
 0x3ad   : > { %v823_v61 = vmul.f32 %v1669_v59, %v815_v60 }
 0x3af   : > { %v824_v62 = vsub.f32 %v812_v51, %v823_v61  ;;  %v1406_v51 = vld [vmem:[%s1751_s7 + $0x8] sm:$0xff] }
 0x3b0   : > { %994 = vmatpush.bf16.msra.mxu2 %v1406_v51 }
 0x3b1   : > { %v825_v38 = vmul.f32 %v824_v62, %v824_v62 }
 0x3b3   : > { %v826_v63 = vsel %vm390_vm0, %v825_v38, 0.0  ;;  %v1409_v38 = vld [vmem:[%s1752_s8 + $0x10] sm:$0xff] }
 0x3b4   : > { %827 = vadd.xlane.f32.xlu1 %v826_v63  ;;  %995 = vmatpush.bf16.msra.mxu2 %v1405_v52 }
 0x427   : > { %v828_v2 = vpop.xlane.xlu1 %827 }
 0x428   : > { %v829_v3 = vmul.f32 %v828_v2, %v1669_v59 }
 0x42a   : > { %v830_v4 = vadd.f32 1e-05, %v829_v3 }
 0x42c   : > { %1430 = vrsqrt.f32 %v830_v4  ;;  %vm837_vm9 = vweird.f32 %v830_v4 }
 0x432   : > { %v1431_v5 = vpop.eup %1430 }
 0x433   : > { %v832_v6 = vmul.f32 %v1431_v5, %v830_v4  ;;  %vm838_vm8 = vweird.f32 %v1431_v5  ;;  %v965_v4 = vperm.slane %v1595_v29, 7  ;;  %v362_v29 = vld [vmem:[%s1753_s9 + $0x10] sm:$0xff] }
 0x434   : > { %vm839_vm10 = vmor %vm837_vm9, %vm838_vm8 }
 0x435   : > { %v833_v7 = vmul.f32 %v1431_v5, %v832_v6 }
 0x437   : > { %v834_v8 = vmul.f32 0.5, %v833_v7 }
 0x439   : > { %v835_v9 = vsub.f32 1.5, %v834_v8  ;;  %v1408_v8 = vld [vmem:[%s1752_s8 + $0x8] sm:$0xff] }
 0x43b   : > { %v836_v10 = vmul.f32 %v1431_v5, %v835_v9  ;;  %v1407_v9 = vld [vmem:[%s1752_s8] sm:$0xff] }
 0x43d   : > { %v840_v12 = vsel %vm839_vm10, %v1431_v5, %v836_v10  ;;  %v972_v10 = vperm.slane %v362_v29, 0 }
 0x43e   : > { %v841_v13 = vmul.f32 %v840_v12, %v824_v62 }
 0x440   : > { %v843_v15 = vmul.f32 %v842_v11, %v841_v13 }
 0x442   : > { %v845_v17 = vadd.f32 %v844_v14, %v843_v15 }
 0x444   : > { %v846_v18 = vpack.c.bf16 %v845_v17, %v845_v17 }
 0x446   : > { %1301 = vmatmul.msk.bf16.vlgmr.msrb.gmra.mxu2 %vm390_vm0, %v846_v18 }
 0x4c9   : > { %v876_v24 = vpop.f32.mrf.mxu2 }
 0x4ca   : > { %v877_v25 = vadd.f32 %v876_v24, %v851_v23 }
 0x4cc   : > { %v880_v26 = vmul.f32 %v877_v25, %v877_v25 }
 0x4ce   : > { %v881_v27 = vmul.f32 %v880_v26, %v877_v25 }
 0x4d0   : > { %v882_v28 = vmul.f32 0.044715, %v881_v27 }
 0x4d1   : > { %v878_v30 = vpop.f32.mrf.mxu2 }
 0x4d2   : > { %v883_v31 = vadd.f32 %v882_v28, %v877_v25 }
 0x4d4   : > { %v884_v32 = vmul.f32 0.7978846, %v883_v31 }
 0x4d6   : > { %1432 = vtanh.f32 %v884_v32 }
 0x4dc   : > { %v1433_v33 = vpop.eup %1432 }
 0x4dd   : > { %v886_v34 = vadd.f32 1.0, %v1433_v33 }
 0x4df   : > { %v887_v35 = vmul.f32 0.5, %v886_v34 }
 0x4e1   : > { %v888_v36 = vmul.f32 %v887_v35, %v877_v25 }
 0x4e3   : > { %v889_v37 = vpack.c.bf16 %v888_v36, %v888_v36 }
 0x4e5   : > { %1318 = vmatmul.msk.bf16.vlgmr.msrb.gmra.mxu0 %vm923_vm11, %v889_v37 }
 0x562   : > { %v936_v41 = vpop.f32.mrf.mxu0 }
 0x563   : > { %v937_v42 = vadd.f32 %v936_v41, %v898_v40 }
 0x565   : > { %v940_v43 = vadd.f32 %v937_v42, %v845_v17  ;;  %v1019_v17 = vperm.slane %v362_v29, 1 }
 0x567   : > { %v941_v44 = vsel %vm390_vm0, %v940_v43, 0.0 }
 0x568   : > { %942 = vadd.xlane.f32.xlu2 %v941_v44 }
 0x56a   : > { %v938_v45 = vpop.f32.mrf.mxu0 }
 0x5db   : > { %v943_v46 = vpop.xlane.xlu2 %942 }
 0x5dc   : > { %v944_v47 = vmul.f32 %v943_v46, %v1669_v59 }
 0x5de   : > { %v945_v48 = vsub.f32 %v940_v43, %v944_v47 }
 0x5e0   : > { %v946_v49 = vmul.f32 %v945_v48, %v945_v48 }
 0x5e2   : > { %v947_v50 = vsel %vm390_vm0, %v946_v49, 0.0 }
 0x5e3   : > { %948 = vadd.xlane.f32.xlu2 %v947_v50 }
 0x656   : > { %v949_v54 = vpop.xlane.xlu2 %948 }
 0x657   : > { %v950_v16 = vmul.f32 %v949_v54, %v1669_v59  ;;  %v1410_v59 = vld [vmem:[%s1752_s8 + $0x18] sm:$0xff] }
 0x658   : > { %1072 = vmatpush.bf16.msrb.mxu3 %v1410_v59 }
 0x659   : > { %v951_v55 = vadd.f32 1e-05, %v950_v16 }
 0x65b   : > { %1434 = vrsqrt.f32 %v951_v55  ;;  %vm958_vm13 = vweird.f32 %v951_v55 }
 0x65c   : > { %1073 = vmatpush.bf16.msrb.mxu3 %v1409_v38 }
 0x660   : > { %1074 = vmatpush.bf16.msrb.mxu3 %v1408_v8 }
 0x661   : > { %v1435_v58 = vpop.eup %1434 }
 0x662   : > { %v953_v60 = vmul.f32 %v1435_v58, %v951_v55  ;;  %vm959_vm12 = vweird.f32 %v1435_v58 }
 0x663   : > { %vm960_vm14 = vmor %vm958_vm13, %vm959_vm12 }
 0x664   : > { %v954_v61 = vmul.f32 %v1435_v58, %v953_v60  ;;  %1075 = vmatpush.bf16.msrb.mxu3 %v1407_v9 }
 0x666   : > { %v955_v62 = vmul.f32 0.5, %v954_v61 }
 0x668   : > { %v956_v63 = vsub.f32 1.5, %v955_v62 }
 0x66a   : > { %v957_v0 = vmul.f32 %v1435_v58, %v956_v63 }
 0x66c   : > { %v961_v2 = vsel %vm960_vm14, %v1435_v58, %v957_v0 }
 0x66d   : > { %v962_v3 = vmul.f32 %v961_v2, %v945_v48 }
 0x66f   : > { %v964_v5 = vmul.f32 %v963_v1, %v962_v3 }
 0x671   : > { %v966_v6 = vadd.f32 %v965_v4, %v964_v5 }
 0x673   : > { %v967_v7 = vpack.c.bf16 %v966_v6, %v966_v6 }
 0x675   : > { %1327 = vmatmul.msk.bf16.vlgmr.msra.gmra.mxu2 %vm390_vm0, %v967_v7 }
 0x6f8   : > { %v997_v11 = vpop.f32.mrf.mxu2 }
 0x6f9   : > { %v998_v12 = vadd.f32 %v997_v11, %v972_v10 }
 0x6fb   : > { %v1001_v13 = vmax.f32 %v998_v12, 0.0 }
 0x6fd   : > { %v1002_v14 = vpack.c.bf16 %v1001_v13, %v1001_v13 }
 0x6ff   : > { %1076 = vmatmul.bf16.vlgmr.msrb.gmra.mxu3 %v1002_v14 }
 0x700   : > { %v999_v15 = vpop.f32.mrf.mxu2 }
 0x782   : > { %v1077_v18 = vpop.f32.mrf.mxu3 }
 0x783   : > { %v1078_v19 = vadd.f32 %v1077_v18, %v1019_v17 }
 0x785   : > { %v1081_v20 = vmax.f32 %v1078_v19, 0.0 }
 0x787   : > { %v1082_v21 = vpack.c.bf16 %v1081_v20, %v1081_v20 }
 0x789   : > { %1083 = vst [vmem:[%s357_s16] sm:$0xf] %v1082_v21 }
 0x78a   : > { %v1079_v22 = vpop.f32.mrf.mxu3 }
 0x78b PF: > { %s20_s13 = sadd.s32 1, %s1442_s13  }
 0x78c   : > { %p17_p4 = scmp.ge.s32.totalorder %s20_s13, 4  }
 0x78e   :  { %19 = sbr.rel (!%p17_p4) target bundleno = 1 (0x1), region = 90 }

</bundles_post_ra>
